<compile_context>
chip_gen: v7x
topology: tpu7x:2x2x1
jax: 0.10.0
libtpu: 0.0.40
codegen_flags: <defaults>
</compile_context>

<pallas_src>
import functools

import jax
import jax.numpy as jnp
from jax.experimental import pallas as pl
from jax.experimental.pallas import tpu as pltpu

BN_EPS = 1e-5
_LANE = 128
_SUBLANE = 8
_MIB = 1 << 20

# Tile caps (all multiples of the (8, 128) register tile). tile_n >= 256 fills
# the 256-wide MXU on v6e/v7x; 512 is near the HBM-roofline sweet spot.
_MAX_TILE_N = 512   # output features per grid step (lane axis of W / out)
_MAX_TILE_D = 512   # features per grid step of the BN pass
_MAX_TILE_B = 512   # batch rows per grid step of the GEMM pass


def _round_up(n, m):
    return (n + m - 1) // m * m


def _split(total, max_tile, align):
    """(num_tiles, tile_size, padded_total) with tile_size % align == 0."""
    total = max(int(total), 1)
    num = pl.cdiv(total, max_tile)
    tile = _round_up(pl.cdiv(total, num), align)
    return num, tile, num * tile


def _vmem_limit(est_bytes):
    # Explicit scoped-VMEM budget; capped at 64 MiB so the same configuration
    # also fits v7x physical VMEM (v5e/v6e have 128 MiB physical).
    return int(min(max(est_bytes, 16 * _MIB), 64 * _MIB))


# ----------------------------------------------------------------------------
# Kernels
# ----------------------------------------------------------------------------
def _bn_normalize_kernel(x_ref, gamma_ref, beta_ref, o_ref, *, batch, pad_rows):
    """Training-mode BatchNorm1d over the batch for one feature tile."""
    x = x_ref[...]                                          # (Bp, tile_d) f32
    inv_b = jnp.float32(1.0 / batch)
    mean = jnp.sum(x, axis=0, keepdims=True) * inv_b        # (1, tile_d)
    centered = x - mean                                     # two-pass: stable
    ssq = jnp.sum(centered * centered, axis=0, keepdims=True)
    if pad_rows:
        # Zero-padded batch rows each contribute exactly mean**2; remove them.
        ssq = ssq - jnp.float32(pad_rows) * (mean * mean)
    var = jnp.maximum(ssq * inv_b, 0.0)                     # biased variance
    scale = gamma_ref[...] * jax.lax.rsqrt(var + BN_EPS)    # rsqrt -> EUP slot
    o_ref[...] = (centered * scale + beta_ref[...]).astype(o_ref.dtype)


def _linear_kernel(x_ref, w_ref, b_ref, o_ref):
    """One (tile_b, Dp) @ (Dp, tile_n) GEMM tile + bias; pure MXU + add."""
    y = jnp.dot(x_ref[...], w_ref[...], preferred_element_type=jnp.float32)
    o_ref[...] = (y + b_ref[...]).astype(o_ref.dtype)


# ----------------------------------------------------------------------------
# Parameters
# ----------------------------------------------------------------------------
def init_params(key, input_size, output_size):
    """Raw params mirroring PyTorch defaults (Linear U(+-1/sqrt(in)), BN 1/0)."""
    kw, kb = jax.random.split(key)
    bound = 1.0 / float(input_size) ** 0.5
    w = jax.random.uniform(kw, (output_size, input_size), jnp.float32,
                           minval=-bound, maxval=bound)
    b = jax.random.uniform(kb, (output_size,), jnp.float32,
                           minval=-bound, maxval=bound)
    gamma = jnp.ones((input_size,), jnp.float32)
    beta = jnp.zeros((input_size,), jnp.float32)
    return gamma, beta, w, b


def prepare_params(gamma, beta, w, b):
    """Pad parameters to lane-dense shapes ONCE (hoisted out of the forward).

    `w` is the PyTorch (out, in) weight; stored transposed + zero-padded so the
    forward path never re-pads (re-copies) the dominant HBM traffic.
    """
    out_f, in_f = w.shape
    _, _, d_pad = _split(in_f, _MAX_TILE_D, _LANE)
    _, _, o_pad = _split(out_f, _MAX_TILE_N, _LANE)
    w_t = jnp.pad(w.astype(jnp.float32).T,
                  ((0, d_pad - in_f), (0, o_pad - out_f)))
    b_p = jnp.pad(b.reshape(1, out_f).astype(jnp.float32),
                  ((0, 0), (0, o_pad - out_f)))
    gamma_p = jnp.pad(gamma.reshape(1, in_f).astype(jnp.float32),
                      ((0, 0), (0, d_pad - in_f)), constant_values=1.0)
    beta_p = jnp.pad(beta.reshape(1, in_f).astype(jnp.float32),
                     ((0, 0), (0, d_pad - in_f)))
    # TODO(synk): optionally store w_t/b in bf16 (f32 accumulation kept) to
    # halve W HBM traffic and double MXU rate on v6e/v7x; kept f32 for exact
    # parity with the PyTorch module.
    return {"gamma": gamma_p, "beta": beta_p, "w_t": w_t, "b": b_p,
            "in_features": in_f, "out_features": out_f}


# ----------------------------------------------------------------------------
# Forward
# ----------------------------------------------------------------------------
def custom_head(x, params, *, batch_norm=True):
    """Forward of CustomHead: (optional training-mode BatchNorm1d) -> Linear."""
    B, D = x.shape
    assert D == params["in_features"]
    O = params["out_features"]

    nd, tile_d, Dp = _split(D, _MAX_TILE_D, _LANE)
    nn_, tile_n, Op = _split(O, _MAX_TILE_N, _LANE)
    nb, tile_b, Bp = _split(B, _MAX_TILE_B, _SUBLANE)
    assert params["w_t"].shape == (Dp, Op)

    # Only x is padded per call (parameters were padded once in prepare_params).
    x_p = jnp.pad(x.astype(jnp.float32), ((0, Bp - B), (0, Dp - D)))

    if batch_norm:
        bn_vmem = 4 * Bp * tile_d * 4 + 8 * tile_d * 4 + 2 * _MIB
        x_p = pl.pallas_call(
            functools.partial(_bn_normalize_kernel, batch=B, pad_rows=Bp - B),
            out_shape=jax.ShapeDtypeStruct((Bp, Dp), jnp.float32),
            grid=(nd,),
            in_specs=[
                pl.BlockSpec((Bp, tile_d), lambda d: (0, d)),
                pl.BlockSpec((1, tile_d), lambda d: (0, d)),
                pl.BlockSpec((1, tile_d), lambda d: (0, d)),
            ],
            out_specs=pl.BlockSpec((Bp, tile_d), lambda d: (0, d)),
            compiler_params=pltpu.CompilerParams(
                dimension_semantics=("parallel",),
                vmem_limit_bytes=_vmem_limit(bn_vmem)),
        )(x_p, params["gamma"], params["beta"])

    # GEMM grid: (output tiles, batch tiles). The streaming weight tile is
    # constant along the inner (batch) axis, so W is read from HBM exactly
    # once; the small normalized-x block is re-read per output tile.
    w_index = lambda j, i: (0, j)
    try:
        w_spec = pl.BlockSpec((Dp, tile_n), w_index,
                              pipeline_mode=pl.Buffered(3))
    except (TypeError, AttributeError):
        # Older JAX without pipeline_mode / Buffered: default double-buffer.
        w_spec = pl.BlockSpec((Dp, tile_n), w_index)

    gemm_vmem = (2 * tile_b * Dp * 4 + 3 * Dp * tile_n * 4
                 + 2 * tile_b * tile_n * 4 + 4 * tile_n * 4 + 2 * _MIB)
    # TODO(synk): for very large in_features, add a K (Dp) grid axis with an
    # f32 accumulator scratch instead of keeping whole-(Dp) tiles resident.
    out_p = pl.pallas_call(
        _linear_kernel,
        out_shape=jax.ShapeDtypeStruct((Bp, Op), x.dtype),
        grid=(nn_, nb),
        in_specs=[
            pl.BlockSpec((tile_b, Dp), lambda j, i: (i, 0)),
            w_spec,
            pl.BlockSpec((1, tile_n), lambda j, i: (0, j)),
        ],
        out_specs=pl.BlockSpec((tile_b, tile_n), lambda j, i: (i, j)),
        compiler_params=pltpu.CompilerParams(
            dimension_semantics=("parallel", "parallel"),
            vmem_limit_bytes=_vmem_limit(gemm_vmem)),
    )(x_p, params["w_t"], params["b"])

    return out_p[:B, :O]


# ----------------------------------------------------------------------------
# Reference + checks
# ----------------------------------------------------------------------------
def reference(x, gamma, beta, w, b, *, batch_norm=True):
    x = x.astype(jnp.float32)
    if batch_norm:
        mean = jnp.mean(x, axis=0, keepdims=True)
        var = jnp.mean((x - mean) ** 2, axis=0, keepdims=True)
        x = (x - mean) * jax.lax.rsqrt(var + BN_EPS) * gamma + beta
    return x @ w.T + b


def _check(batch, input_size, output_size, seed, batch_norm=True):
    key = jax.random.PRNGKey(seed)
    kx, kp = jax.random.split(key)
    # Shifted/scaled inputs exercise the numerically-stable two-pass variance.
    x = jax.random.normal(kx, (batch, input_size), jnp.float32) * 2.0 + 3.0
    gamma, beta, w, b = init_params(kp, input_size, output_size)
    params = prepare_params(gamma, beta, w, b)   # padded once, off the hot path

    out = jax.block_until_ready(custom_head(x, params, batch_norm=batch_norm))
    ref = reference(x, gamma, beta, w, b, batch_norm=batch_norm)
    assert out.shape == (batch, output_size)
    assert jnp.allclose(out, ref, atol=1e-4, rtol=1e-4), (
        f"mismatch (bn={batch_norm}): max abs err "
        f"{jnp.max(jnp.abs(out - ref))}")


if __name__ == "__main__":
    # Primary example: shapes consistent with a small classification head.
    _check(batch=8, input_size=32, output_size=16, seed=0)
    # Odd shapes exercise the sublane/lane padding paths, with and without BN.
    _check(batch=6, input_size=20, output_size=10, seed=0, batch_norm=True)
    _check(batch=6, input_size=20, output_size=10, seed=0, batch_norm=False)
    # Multi-tile grids (several feature tiles and several output tiles).
    _check(batch=16, input_size=640, output_size=600, seed=0)
    print("KERNEL_OK")
</pallas_src>

<mosaic_0001>
module attributes {stable_mosaic.version = 11 : i64} {
  func.func @_bn_normalize_kernel(%arg0: i32, %arg1: memref<8x128xf32, #tpu.memory_space<vmem>>, %arg2: memref<1x128xf32, #tpu.memory_space<vmem>>, %arg3: memref<1x128xf32, #tpu.memory_space<vmem>>, %arg4: memref<8x128xf32, #tpu.memory_space<vmem>>) attributes {dimension_semantics = [#tpu.dimension_semantics<parallel>], iteration_bounds = array<i64: 1>, scalar_prefetch = 0 : i64, scratch_operands = 0 : i64, tpu.core_type = #tpu.core_type<tc>, window_params = [{transform_indices = @transform_0, window_bounds = array<i64: 8, 128>}, {transform_indices = @transform_1, window_bounds = array<i64: 1, 128>}, {transform_indices = @transform_2, window_bounds = array<i64: 1, 128>}, {transform_indices = @transform_3, window_bounds = array<i64: 8, 128>}]} {
    %c0 = arith.constant 0 : index
    %c0_0 = arith.constant 0 : index
    %0 = vector.load %arg1[%c0, %c0_0] : memref<8x128xf32, #tpu.memory_space<vmem>>, vector<8x128xf32>
    %cst = arith.constant dense<0.000000e+00> : vector<128xf32>
    %1 = vector.multi_reduction <add>, %0, %cst [0] : vector<8x128xf32> to vector<128xf32>
    %2 = vector.shape_cast %1 : vector<128xf32> to vector<1x128xf32>
    %cst_1 = arith.constant 1.250000e-01 : f32
    %3 = vector.broadcast %cst_1 : f32 to vector<1x128xf32>
    %4 = arith.mulf %2, %3 : vector<1x128xf32>
    %5 = vector.broadcast %4 : vector<1x128xf32> to vector<8x128xf32>
    %6 = arith.subf %0, %5 : vector<8x128xf32>
    %7 = arith.mulf %6, %6 : vector<8x128xf32>
    %cst_2 = arith.constant dense<0.000000e+00> : vector<128xf32>
    %8 = vector.multi_reduction <add>, %7, %cst_2 [0] : vector<8x128xf32> to vector<128xf32>
    %9 = vector.shape_cast %8 : vector<128xf32> to vector<1x128xf32>
    %cst_3 = arith.constant 1.250000e-01 : f32
    %10 = vector.broadcast %cst_3 : f32 to vector<1x128xf32>
    %11 = arith.mulf %9, %10 : vector<1x128xf32>
    %cst_4 = arith.constant 0.000000e+00 : f32
    %12 = vector.broadcast %cst_4 : f32 to vector<1x128xf32>
    %13 = arith.maximumf %11, %12 : vector<1x128xf32>
    %c0_5 = arith.constant 0 : index
    %c0_6 = arith.constant 0 : index
    %14 = vector.load %arg2[%c0_5, %c0_6] : memref<1x128xf32, #tpu.memory_space<vmem>>, vector<1x128xf32>
    %cst_7 = arith.constant 9.99999974E-6 : f32
    %15 = vector.broadcast %cst_7 : f32 to vector<1x128xf32>
    %16 = arith.addf %13, %15 : vector<1x128xf32>
    %17 = math.rsqrt %16 : vector<1x128xf32>
    %18 = arith.mulf %14, %17 : vector<1x128xf32>
    %19 = vector.broadcast %18 : vector<1x128xf32> to vector<8x128xf32>
    %20 = arith.mulf %6, %19 : vector<8x128xf32>
    %c0_8 = arith.constant 0 : index
    %c0_9 = arith.constant 0 : index
    %21 = vector.load %arg3[%c0_8, %c0_9] : memref<1x128xf32, #tpu.memory_space<vmem>>, vector<1x128xf32>
    %22 = vector.broadcast %21 : vector<1x128xf32> to vector<8x128xf32>
    %23 = arith.addf %20, %22 : vector<8x128xf32>
    %c0_10 = arith.constant 0 : index
    %c0_11 = arith.constant 0 : index
    %24 = vector.load %arg4[%c0_10, %c0_11] : memref<8x128xf32, #tpu.memory_space<vmem>>, vector<8x128xf32>
    tpu.vector_store %arg4[%c0_10, %c0_11], %23 {strides = array<i32>} : memref<8x128xf32, #tpu.memory_space<vmem>>, vector<8x128xf32>,
    return
  }
  func.func @transform_0(%arg0: i32) -> (i32, i32) {
    %c0_i32 = arith.constant 0 : i32
    %c0_i32_0 = arith.constant 0 : i32
    return %c0_i32, %arg0 : i32, i32
  }
  func.func @transform_1(%arg0: i32) -> (i32, i32) {
    %c0_i32 = arith.constant 0 : i32
    %c0_i32_0 = arith.constant 0 : i32
    return %c0_i32, %arg0 : i32, i32
  }
  func.func @transform_2(%arg0: i32) -> (i32, i32) {
    %c0_i32 = arith.constant 0 : i32
    %c0_i32_0 = arith.constant 0 : i32
    return %c0_i32, %arg0 : i32, i32
  }
  func.func @transform_3(%arg0: i32) -> (i32, i32) {
    %c0_i32 = arith.constant 0 : i32
    %c0_i32_0 = arith.constant 0 : i32
    return %c0_i32, %arg0 : i32, i32
  }
}

</mosaic_0001>

<bundles_post_ra>
// kernel: tpu_custom_call.1
= control target key start
LH: loop header
LB: loop body
LE: loop exit
PB: predicated region body
PF: predicated region fallthrough
CT: control target
= control target key end

     0   :  { %8 = vsyncpa [#allocation3], 0  ;;  %s185_s0 = inlined_call_operand.hbm [shape: f32[8,128], index: 0, kind: input, shape index: {}]   ;;  %s186_s1 = inlined_call_operand.vmem [shape: f32[1,128], index: 1, kind: input, shape index: {}]   ;;  %s187_s2 = inlined_call_operand.vmem [shape: f32[1,128], index: 2, kind: input, shape index: {}]   ;;  %s188_s3 = inlined_call_operand.hbm [shape: f32[8,128], index: 3, kind: output, shape index: {}]  }
   0x1   :  { %9 = vsyncpa [#allocation4], 0  ;;  %s133_s12 = smov [#allocation2]   ;;  %s85_s16 = scalar_lea.hbm %s185_s0, 128 }
   0x2   :  { %s16_s13 = sshll.u32 %s133_s12, 4  ;;  %p86_p0 = scmp.ne.s32.totalorder %s185_s0, %s85_s16  ;;  %s17_s13 = int_to_ptr.vmem [resolvable:$true] %s16_s13 }
   0x3   :  { %p89_p1 = scmp.lt.u32.totalorder %s85_s16, %s185_s0 }
   0x5   :  { %p91_p2 = pnand %p89_p1, %p86_p0 }
   0x7   :  { %94 = shalt.err (!%p91_p2)
}
   0x8   :  { %s95_s21 = scalar_lea.vmem %s17_s13, 128  ;;  %p100_p4 = scmp.lt.s32.totalorder %s17_s13, %s17_s13 }
   0x9   :  { %p96_p3 = scmp.ne.s32.totalorder %s17_s13, %s95_s21  ;;  %p101_p5 = scmp.lt.s32.totalorder %s95_s21, %s95_s21 }
   0xb   :  { %p102_p6 = por %p101_p5, %p100_p4 }
   0xd   :  { %p103_p7 = pnand %p102_p6, %p96_p3 }
   0xf   :  { %106 = shalt.err (!%p103_p7)
}
  0x10   :  { %19 = dma.hbm_to_vmem [thread:$0]  %s185_s0, 128, %s17_s13, [#allocation3]  }
  0x11   :  { %129 = dma.done.wait [#allocation3], 128  }
  0x12   :  { %130 = vsyncadd [#allocation3], 4294967168  ;;  %v27_v0 = vld [vmem:[#allocation2] sm:$0xff]  ;;  %v50_v19 = vlaneseq  ;;  %s134_s27 = smov [#allocation5]  }
  0x13   :  { %v28_v1 = vrot.slane %v27_v0, 4  ;;  %v45_v21 = vld [vmem:[%s186_s1] sm:$0x1]  ;;  %s71_s28 = sshll.u32 %s134_s27, 4  ;;  %s72_s28 = int_to_ptr.vmem [resolvable:$true] %s71_s28 }
  0x14   :  { %v51_v20 = vshrl.u32 %v50_v19, 7  ;;  %v80_v26 = vld [vmem:[%s187_s2] ss:$0 sm:$0xff]  ;;  %s107_s29 = scalar_lea.vmem %s72_s28, 128  ;;  %p112_p9 = scmp.lt.s32.totalorder %s72_s28, %s72_s28 }
  0x15   :  { %v29_v2 = vadd.f32 %v28_v1, %v27_v0  ;;  %p108_p8 = scmp.ne.s32.totalorder %s72_s28, %s107_s29  ;;  %p113_p10 = scmp.lt.s32.totalorder %s107_s29, %s107_s29 }
  0x16   :  { %v52_v22 = vsub.s32 0, %v51_v20 }
  0x17   :  { %v30_v3 = vrot.slane %v29_v2, 2  ;;  %p114_p11 = por %p113_p10, %p112_p9 }
  0x19   :  { %v31_v4 = vadd.f32 %v30_v3, %v29_v2  ;;  %p115_p12 = pnand %p114_p11, %p108_p8 }
  0x1b   :  { %v32_v5 = vrot.slane %v31_v4, 1 }
  0x1d   :  { %v33_v6 = vadd.f32 %v32_v5, %v31_v4 }
  0x1f   :  { %v34_v7 = vmul.f32 0.125, %v33_v6 }
  0x21   :  { %v35_v8 = vsub.f32 %v27_v0, %v34_v7 }
  0x23   :  { %v36_v9 = vmul.f32 %v35_v8, %v35_v8 }
  0x25   :  { %v37_v10 = vrot.slane %v36_v9, 4 }
  0x27   :  { %v38_v11 = vadd.f32 %v37_v10, %v36_v9 }
  0x29   :  { %v39_v12 = vrot.slane %v38_v11, 2 }
  0x2b   :  { %v40_v13 = vadd.f32 %v39_v12, %v38_v11 }
  0x2d   :  { %v41_v14 = vrot.slane %v40_v13, 1 }
  0x2f   :  { %v42_v15 = vadd.f32 %v41_v14, %v40_v13 }
  0x31   :  { %v43_v16 = vmul.f32 0.125, %v42_v15 }
  0x33   :  { %v44_v17 = vmax.f32 %v43_v16, 0.0 }
  0x35   :  { %v46_v18 = vadd.f32 1e-05, %v44_v17 }
  0x37   :  { %83 = vrsqrt.f32 %v46_v18 }
  0x41   :  { %v84_v23 = vpop.eup %83 }
  0x42   :  { %v48_v24 = vmul.f32 %v84_v23, %v45_v21 }
  0x44   :  { %v53_v25 = vrot.slane %v48_v24, %v52_v22 }
  0x46   :  { %v55_v27 = vmul.f32 %v53_v25, %v35_v8 }
  0x48   :  { %v63_v28 = vadd.f32 %v80_v26, %v55_v27 }
  0x4a   :  { %64 = vst [vmem:[#allocation5] sm:$0xff] %v63_v28 }
  0x4b   :  { %118 = shalt.err (!%p115_p12)
}
  0x4c   :  { %s119_s4 = scalar_lea.hbm %s188_s3, 128 }
  0x4d   :  { %p120_p13 = scmp.ne.s32.totalorder %s188_s3, %s119_s4  ;;  %p123_p0 = scmp.lt.u32.totalorder %s119_s4, %s188_s3 }
  0x4f   :  { %p125_p1 = pnand %p123_p0, %p120_p13 }
  0x51   :  { %128 = shalt.err (!%p125_p1)
}
  0x52   :  { %74 = dma.vmem_to_hbm [thread:$0]  %s72_s28, 128, %s188_s3, [#allocation4]  }
  0x53   :  { %131 = dma.done.wait [#allocation4], 128  }
  0x54   :  { %132 = vsyncadd [#allocation4], 4294967168 }
  0x55   :  { %78 = vsyncpa [#allocation3], 1 }
  0x56   :  { %79 = vsyncpa [#allocation4], 1 }

</bundles_post_ra>
